<compile_context>
chip_gen: v5e
topology: v5e:2x2
jax: 0.10.0
libtpu: 0.0.40
codegen_flags: <defaults>
</compile_context>

<pallas_src>
import jax
import jax.numpy as jnp
from jax import lax
from jax.experimental import pallas as pl
from jax.experimental.pallas import tpu as pltpu


def _round_up(x, m):
    return (x + m - 1) // m * m


def _round_down(x, m):
    return x // m * m


def _router_kernel(x_ref, w1_ref, b1_ref, w2_ref, b2_ref, w3t_ref, b3t_ref, o_ref):
    # bf16 operands for the MXU (weights already arrive bf16); f32 accumulation
    # and f32 elementwise math (bias add / ReLU / sigmoid) -- v5e-safe split.
    x = x_ref[...].astype(jnp.bfloat16)

    # Linear 1 + ReLU (f32), then downcast for the next MXU op.
    h1 = jnp.dot(x, w1_ref[...], preferred_element_type=jnp.float32) + b1_ref[...]
    h1 = jnp.maximum(h1, 0.0).astype(jnp.bfloat16)

    # Linear 2 + ReLU (f32), then downcast.
    h2 = jnp.dot(h1, w2_ref[...], preferred_element_type=jnp.float32) + b2_ref[...]
    h2 = jnp.maximum(h2, 0.0).astype(jnp.bfloat16)

    # Head, computed transposed so the store is lane-dense:
    #   logits_t[o, m] = sum_h w3t[o, h] * h2[m, h]        -> (out_c, tm)
    # With out_c == 1 the natural (tm, 1) layout would be a 1/128 masked vst;
    # putting rows on the lane axis gives unmasked, full-width stores.
    logits_t = lax.dot_general(
        w3t_ref[...], h2, (((1,), (1,)), ((), ())),
        preferred_element_type=jnp.float32) + b3t_ref[...]

    o_ref[...] = jax.nn.sigmoid(logits_t).astype(o_ref.dtype)


def _choose_tile_m(M, C, hidden, out_c, tile_m, budget_bytes):
    """Pick the row-tile size from an explicit VMEM budget.

    Per-row live bytes: x f32 x 2 pipeline buffers (8*C) + h1 f32+bf16 (6*C)
    + h2 f32+bf16 (6*hidden) + transposed f32 output x 2 buffers (8*out_c).
    Weights/biases are single-buffered bf16/f32 (Buffered(1)).
    """
    if M <= 128:
        # Single full block: block shape equals the array dims, so no
        # (8,128) divisibility constraint applies.
        return M
    per_row = 8 * C + 6 * C + 6 * hidden + 8 * out_c
    w_bytes = 2 * (C * C + C * hidden + hidden * out_c) + 4 * (C + hidden + out_c)
    tm_budget = _round_down(max(budget_bytes - w_bytes, 128 * per_row) // per_row, 128)
    # Guarantee >= 4 grid steps so both v7x TensorCores (and the pipeline)
    # have work; negligible per-step overhead at these sizes.
    tm_split = _round_up(pl.cdiv(M, 4), 128)
    tm_cap = max(128, _round_up(tile_m, 128))
    return max(128, min(tm_cap, tm_budget, tm_split))


def router_forward(xs, params, stage, *, tile_m=1024, vmem_budget_bytes=20 << 20):
    """xs: (B, N, C).  params: list of per-stage dicts of weights.

    Returns (B, N, out_channels), matching AdaptiveRouter4LaneV3.forward
    (both training and eval paths => plain sigmoid of the MLP logits).
    """
    B, N, C = xs.shape
    M = B * N
    p = params[stage]                       # stage is a Python int (ModuleList index)

    # Weights go to bf16 for the MXU (tiny, grid-invariant arrays -- the cast
    # cost is negligible and amortized across every row).  Biases stay f32:
    # they are added after the f32 accumulation.
    w1 = p["w1"].astype(jnp.bfloat16)       # (C, C)
    b1 = p["b1"]                            # (1, C)
    w2 = p["w2"].astype(jnp.bfloat16)       # (C, hidden)
    b2 = p["b2"]                            # (1, hidden)
    w3t = jnp.transpose(p["w3"]).astype(jnp.bfloat16)   # (out_c, hidden)
    b3t = jnp.transpose(p["b3"])                        # (out_c, 1)
    hidden = w2.shape[1]
    out_c = w3t.shape[0]

    tm = _choose_tile_m(M, C, hidden, out_c, tile_m, vmem_budget_bytes)
    grid = (pl.cdiv(M, tm),)                # partial tail block: reads padded,
                                            # writes masked by Pallas.

    # No astype, no pad: stream x in its native dtype straight from HBM.
    x2d = xs.reshape(M, C)

    full = lambda i: (0, 0)                 # weights resident across every tile
    wspec = lambda shape: pl.BlockSpec(shape, full, pipeline_mode=pl.Buffered(1))

    # VMEM budget estimate -> explicit scoped-VMEM limit (v5e default is only
    # 16 MiB, v6e/v7x 32 MiB); keep it well under v7x's 64 MiB physical.
    per_row = 8 * C + 6 * C + 6 * hidden + 8 * out_c
    w_bytes = 2 * (C * C + C * hidden + hidden * out_c) + 4 * (C + hidden + out_c)
    est_bytes = per_row * tm + w_bytes + (1 << 20)
    vmem_limit = int(min(40 << 20, max(24 << 20, 2 * est_bytes)))

    cost = pl.CostEstimate(
        flops=2 * M * (C * C + C * hidden + hidden * out_c),
        transcendentals=M * out_c,
        bytes_accessed=M * C * xs.dtype.itemsize + w_bytes + M * out_c * 4,
    )

    out_t = pl.pallas_call(
        _router_kernel,
        out_shape=jax.ShapeDtypeStruct((out_c, M), xs.dtype),
        grid_spec=pltpu.PrefetchScalarGridSpec(
            num_scalar_prefetch=0,
            grid=grid,
            in_specs=[
                pl.BlockSpec((tm, C), lambda i: (i, 0)),      # x tile (streamed)
                wspec((C, C)),                                # w1 (bf16)
                wspec((1, C)),                                # b1 (f32)
                wspec((C, hidden)),                           # w2 (bf16)
                wspec((1, hidden)),                           # b2 (f32)
                wspec((out_c, hidden)),                       # w3^T (bf16)
                wspec((out_c, 1)),                            # b3^T (f32)
            ],
            out_specs=pl.BlockSpec((out_c, tm), lambda i: (0, i)),
        ),
        compiler_params=pltpu.CompilerParams(
            dimension_semantics=("parallel",),                # megacore / v7x 2-TC
            vmem_limit_bytes=vmem_limit),
        cost_estimate=cost,
    )(x2d, w1, b1, w2, b2, w3t, b3t)

    # Undo the lane-dense transpose (free layout plumbing); out_t is exactly
    # (out_c, M), the partial tail block never reached HBM.
    return jnp.transpose(out_t).reshape(B, N, out_c)


def init_params(key, inplane, reduction, out_channels, stages):
    """Deterministic synthetic parameter init (Linear stored as (in, out))."""
    params = []
    hidden = inplane // reduction
    for s in range(stages):
        ks = jax.random.fold_in(key, s)
        k1, k2, k3 = jax.random.split(ks, 3)
        params.append({
            "w1": 0.05 * jax.random.normal(k1, (inplane, inplane), jnp.float32),
            "b1": jnp.full((1, inplane), 0.01, jnp.float32),
            "w2": 0.05 * jax.random.normal(k2, (inplane, hidden), jnp.float32),
            "b2": jnp.full((1, hidden), 0.01, jnp.float32),
            "w3": 0.05 * jax.random.normal(k3, (hidden, out_channels), jnp.float32),
            "b3": jnp.full((1, out_channels), 0.01, jnp.float32),
        })
    return params


def reference_forward(xs, params, stage, *, emulate_bf16_matmul=True):
    """Pure-JAX reference of the PyTorch module (plain-sigmoid path).

    With emulate_bf16_matmul=True the matmul operands are cast to bf16 (f32
    accumulation), matching the kernel's numerics for a tight comparison;
    with False it is the true f32 module for a looser sanity check.
    """
    p = params[stage]
    cast = (lambda a: a.astype(jnp.bfloat16)) if emulate_bf16_matmul else (lambda a: a)
    x = xs
    h1 = jnp.maximum(
        jnp.dot(cast(x), cast(p["w1"]), preferred_element_type=jnp.float32)
        + p["b1"][0], 0.0)
    h2 = jnp.maximum(
        jnp.dot(cast(h1), cast(p["w2"]), preferred_element_type=jnp.float32)
        + p["b2"][0], 0.0)
    logits = (jnp.dot(cast(h2), cast(p["w3"]), preferred_element_type=jnp.float32)
              + p["b3"][0])
    return jax.nn.sigmoid(logits)


if __name__ == "__main__":
    inplane, reduction, out_channels, stages = 32, 4, 1, 3
    key = jax.random.PRNGKey(0)
    k_x, k_w, k_x2 = jax.random.split(key, 3)
    params = init_params(k_w, inplane, reduction, out_channels, stages)

    # Small case consistent with the module's forward: xs is (B, N, C).
    B, N = 2, 8
    xs = jax.random.normal(k_x, (B, N, inplane), jnp.float32)
    stage = 1
    out = jax.block_until_ready(router_forward(xs, params, stage))
    ref_bf = reference_forward(xs, params, stage, emulate_bf16_matmul=True)
    ref_f32 = reference_forward(xs, params, stage, emulate_bf16_matmul=False)
    assert out.shape == (B, N, out_channels), out.shape
    assert jnp.allclose(out, ref_bf, atol=2e-3, rtol=2e-3), (
        float(jnp.max(jnp.abs(out - ref_bf))))
    # Looser check vs. the true f32 module (documents bf16-operand error).
    assert jnp.allclose(out, ref_f32, atol=3e-2, rtol=3e-2), (
        float(jnp.max(jnp.abs(out - ref_f32))))

    # Larger case: multi-step grid with a partial (masked) tail block
    # (M = 1500 -> tm = 384, grid of 4 steps, last block covers rows 1152:1536).
    B2, N2 = 5, 300
    xs2 = jax.random.normal(k_x2, (B2, N2, inplane), jnp.float32)
    out2 = jax.block_until_ready(router_forward(xs2, params, 0, tile_m=1024))
    ref2_bf = reference_forward(xs2, params, 0, emulate_bf16_matmul=True)
    ref2_f32 = reference_forward(xs2, params, 0, emulate_bf16_matmul=False)
    assert out2.shape == (B2, N2, out_channels), out2.shape
    assert jnp.allclose(out2, ref2_bf, atol=2e-3, rtol=2e-3), (
        float(jnp.max(jnp.abs(out2 - ref2_bf))))
    assert jnp.allclose(out2, ref2_f32, atol=3e-2, rtol=3e-2), (
        float(jnp.max(jnp.abs(out2 - ref2_f32))))

    print("KERNEL_OK")
</pallas_src>

<mosaic_0001>
module attributes {stable_mosaic.version = 11 : i64} {
  func.func @_router_kernel(%arg0: i32, %arg1: memref<16x32xf32, #tpu.memory_space<vmem>>, %arg2: memref<32x32xbf16, #tpu.memory_space<vmem>>, %arg3: memref<1x32xf32, #tpu.memory_space<vmem>>, %arg4: memref<32x8xbf16, #tpu.memory_space<vmem>>, %arg5: memref<1x8xf32, #tpu.memory_space<vmem>>, %arg6: memref<1x8xbf16, #tpu.memory_space<vmem>>, %arg7: memref<1x1xf32, #tpu.memory_space<vmem>>, %arg8: memref<1x16xf32, #tpu.memory_space<vmem>>) attributes {dimension_semantics = [#tpu.dimension_semantics<parallel>], iteration_bounds = array<i64: 1>, scalar_prefetch = 0 : i64, scratch_operands = 0 : i64, tpu.core_type = #tpu.core_type<tc>, window_params = [{transform_indices = @transform_0, window_bounds = array<i64: 16, 32>}, {pipeline_mode = #tpu.pipeline_mode<synchronous>, transform_indices = @transform_1, window_bounds = array<i64: 32, 32>}, {pipeline_mode = #tpu.pipeline_mode<synchronous>, transform_indices = @transform_2, window_bounds = array<i64: 1, 32>}, {pipeline_mode = #tpu.pipeline_mode<synchronous>, transform_indices = @transform_3, window_bounds = array<i64: 32, 8>}, {pipeline_mode = #tpu.pipeline_mode<synchronous>, transform_indices = @transform_4, window_bounds = array<i64: 1, 8>}, {pipeline_mode = #tpu.pipeline_mode<synchronous>, transform_indices = @transform_5, window_bounds = array<i64: 1, 8>}, {pipeline_mode = #tpu.pipeline_mode<synchronous>, transform_indices = @transform_6, window_bounds = array<i64: 1, 1>}, {transform_indices = @transform_7, window_bounds = array<i64: 1, 16>}]} {
    %c0 = arith.constant 0 : index
    %c0_0 = arith.constant 0 : index
    %0 = vector.load %arg1[%c0, %c0_0] : memref<16x32xf32, #tpu.memory_space<vmem>>, vector<16x32xf32>
    %1 = arith.truncf %0 : vector<16x32xf32> to vector<16x32xbf16>
    %c0_1 = arith.constant 0 : index
    %c0_2 = arith.constant 0 : index
    %2 = vector.load %arg2[%c0_1, %c0_2] : memref<32x32xbf16, #tpu.memory_space<vmem>>, vector<32x32xbf16>
    %cst = arith.constant dense<0.000000e+00> : vector<16x32xf32>
    %3 = tpu.matmul %1, %2, %cst {dimension_numbers = #tpu.dot_dimension_numbers<[1], [0], [0], [1], [0, 0, 1, 1], [], []>} : vector<16x32xbf16>, vector<32x32xbf16>, vector<16x32xf32> -> vector<16x32xf32>
    %c0_3 = arith.constant 0 : index
    %c0_4 = arith.constant 0 : index
    %4 = vector.load %arg3[%c0_3, %c0_4] : memref<1x32xf32, #tpu.memory_space<vmem>>, vector<1x32xf32>
    %5 = vector.broadcast %4 : vector<1x32xf32> to vector<16x32xf32>
    %6 = arith.addf %3, %5 : vector<16x32xf32>
    %cst_5 = arith.constant 0.000000e+00 : f32
    %7 = vector.broadcast %cst_5 : f32 to vector<16x32xf32>
    %8 = arith.maximumf %6, %7 : vector<16x32xf32>
    %9 = arith.truncf %8 : vector<16x32xf32> to vector<16x32xbf16>
    %c0_6 = arith.constant 0 : index
    %c0_7 = arith.constant 0 : index
    %10 = vector.load %arg4[%c0_6, %c0_7] : memref<32x8xbf16, #tpu.memory_space<vmem>>, vector<32x8xbf16>
    %cst_8 = arith.constant dense<0.000000e+00> : vector<16x8xf32>
    %11 = tpu.matmul %9, %10, %cst_8 {dimension_numbers = #tpu.dot_dimension_numbers<[1], [0], [0], [1], [0, 0, 1, 1], [], []>} : vector<16x32xbf16>, vector<32x8xbf16>, vector<16x8xf32> -> vector<16x8xf32>
    %c0_9 = arith.constant 0 : index
    %c0_10 = arith.constant 0 : index
    %12 = vector.load %arg5[%c0_9, %c0_10] : memref<1x8xf32, #tpu.memory_space<vmem>>, vector<1x8xf32>
    %13 = vector.broadcast %12 : vector<1x8xf32> to vector<16x8xf32>
    %14 = arith.addf %11, %13 : vector<16x8xf32>
    %cst_11 = arith.constant 0.000000e+00 : f32
    %15 = vector.broadcast %cst_11 : f32 to vector<16x8xf32>
    %16 = arith.maximumf %14, %15 : vector<16x8xf32>
    %17 = arith.truncf %16 : vector<16x8xf32> to vector<16x8xbf16>
    %c0_12 = arith.constant 0 : index
    %c0_13 = arith.constant 0 : index
    %18 = vector.load %arg6[%c0_12, %c0_13] : memref<1x8xbf16, #tpu.memory_space<vmem>>, vector<1x8xbf16>
    %cst_14 = arith.constant dense<0.000000e+00> : vector<1x16xf32>
    %19 = tpu.matmul %18, %17, %cst_14 {dimension_numbers = #tpu.dot_dimension_numbers<[1], [1], [0], [0], [0, 0, 1, 0], [], []>} : vector<1x8xbf16>, vector<16x8xbf16>, vector<1x16xf32> -> vector<1x16xf32>
    %c0_15 = arith.constant 0 : index
    %c0_16 = arith.constant 0 : index
    %20 = vector.load %arg7[%c0_15, %c0_16] : memref<1x1xf32, #tpu.memory_space<vmem>>, vector<1x1xf32>
    %21 = vector.broadcast %20 : vector<1x1xf32> to vector<1x16xf32>
    %22 = arith.addf %19, %21 : vector<1x16xf32>
    %23 = arith.negf %22 : vector<1x16xf32>
    %24 = math.exp %23 : vector<1x16xf32>
    %cst_17 = arith.constant 1.000000e+00 : f32
    %25 = vector.broadcast %cst_17 : f32 to vector<1x16xf32>
    %26 = arith.addf %25, %24 : vector<1x16xf32>
    %27 = arith.divf %25, %26 : vector<1x16xf32>
    %c0_18 = arith.constant 0 : index
    %c0_19 = arith.constant 0 : index
    %28 = vector.load %arg8[%c0_18, %c0_19] : memref<1x16xf32, #tpu.memory_space<vmem>>, vector<1x16xf32>
    tpu.vector_store %arg8[%c0_18, %c0_19], %27 {strides = array<i32>} : memref<1x16xf32, #tpu.memory_space<vmem>>, vector<1x16xf32>,
    return
  }
  func.func @transform_0(%arg0: i32) -> (i32, i32) {
    %c0_i32 = arith.constant 0 : i32
    %c0_i32_0 = arith.constant 0 : i32
    return %arg0, %c0_i32 : i32, i32
  }
  func.func @transform_1(%arg0: i32) -> (i32, i32) {
    %c0_i32 = arith.constant 0 : i32
    %c0_i32_0 = arith.constant 0 : i32
    %c0_i32_1 = arith.constant 0 : i32
    return %c0_i32, %c0_i32_0 : i32, i32
  }
  func.func @transform_2(%arg0: i32) -> (i32, i32) {
    %c0_i32 = arith.constant 0 : i32
    %c0_i32_0 = arith.constant 0 : i32
    %c0_i32_1 = arith.constant 0 : i32
    return %c0_i32, %c0_i32_0 : i32, i32
  }
  func.func @transform_3(%arg0: i32) -> (i32, i32) {
    %c0_i32 = arith.constant 0 : i32
    %c0_i32_0 = arith.constant 0 : i32
    %c0_i32_1 = arith.constant 0 : i32
    return %c0_i32, %c0_i32_0 : i32, i32
  }
  func.func @transform_4(%arg0: i32) -> (i32, i32) {
    %c0_i32 = arith.constant 0 : i32
    %c0_i32_0 = arith.constant 0 : i32
    %c0_i32_1 = arith.constant 0 : i32
    return %c0_i32, %c0_i32_0 : i32, i32
  }
  func.func @transform_5(%arg0: i32) -> (i32, i32) {
    %c0_i32 = arith.constant 0 : i32
    %c0_i32_0 = arith.constant 0 : i32
    %c0_i32_1 = arith.constant 0 : i32
    return %c0_i32, %c0_i32_0 : i32, i32
  }
  func.func @transform_6(%arg0: i32) -> (i32, i32) {
    %c0_i32 = arith.constant 0 : i32
    %c0_i32_0 = arith.constant 0 : i32
    %c0_i32_1 = arith.constant 0 : i32
    return %c0_i32, %c0_i32_0 : i32, i32
  }
  func.func @transform_7(%arg0: i32) -> (i32, i32) {
    %c0_i32 = arith.constant 0 : i32
    %c0_i32_0 = arith.constant 0 : i32
    return %c0_i32, %arg0 : i32, i32
  }
}

</mosaic_0001>

<bundles_post_ra>
// kernel: tpu_custom_call.1
= control target key start
LH: loop header
LB: loop body
LE: loop exit
PB: predicated region body
PF: predicated region fallthrough
CT: control target
= control target key end

     0   :  { %s359_s0 = inlined_call_operand.vmem [shape: f32[16,32], index: 0, kind: input, shape index: {}]   ;;  %s360_s1 = inlined_call_operand.hbm [shape: bf16[32,32], index: 1, kind: input, shape index: {}]   ;;  %s361_s2 = inlined_call_operand.vmem [shape: f32[1,32], index: 2, kind: input, shape index: {}]   ;;  %s362_s3 = inlined_call_operand.vmem [shape: bf16[32,8], index: 3, kind: input, shape index: {}]   ;;  %s363_s4 = inlined_call_operand.vmem [shape: f32[1,8], index: 4, kind: input, shape index: {}]   ;;  %s364_s5 = inlined_call_operand.vmem [shape: bf16[1,8], index: 5, kind: input, shape index: {}]   ;;  %s365_s6 = inlined_call_operand.<no memory space> [shape: f32[1,1], index: 6, kind: input, shape index: {}]   ;;  %s366_s7 = inlined_call_operand.hbm [shape: f32[1,16], index: 7, kind: output, shape index: {}]  }
   0x1   :  { %v12_v0 = vstv %s365_s6 }
   0x2   :  { %13 = vst [vmem:[#allocation2] sm:$0x1] %v12_v0 }
   0x3   :  { %14 = vsyncpa [#allocation4], 0 }
   0x4   :  { %15 = vsyncpa [#allocation5], 0  ;;  %s22_s28 = sshll.u32 %s360_s1, 4  ;;  %s284_s29 = smov [#allocation3]   ;;  %s23_s28 = int_to_ptr.hbm [resolvable:$true] %s22_s28 }
   0x5   :  { %s24_s30 = sshll.u32 %s284_s29, 4  ;;  %s285_s8 = smov 64   ;;  %s25_s30 = int_to_ptr.vmem [resolvable:$true] %s24_s30 }
   0x6   :  { %s286_s9 = smov 4  }
   0x7   :  { %30 = dma.hbm_to_vmem [thread:$0]  %s23_s28, 256, %s25_s30, [#allocation4], %s285_s8, %s285_s8, %s286_s9  }
   0x8   :  { %280 = dma.done.wait [#allocation4], 256  }
   0x9   :  { %281 = vsyncadd [#allocation4], 4294967040  ;;  %v217_v1 = vld [vmem:[#allocation3 + $0x8] sm:$0xff]  ;;  %v216_v2 = vld [vmem:[#allocation3] sm:$0xff]  ;;  %vm69_vm0 = vcmask 261120   ;;  %v287_v17 = vmov 0  }
   0xa   :  { %79 = vmatpush.bf16.msra.mxu0 %v217_v1  ;;  %v46_v3 = vld [vmem:[%s359_s0] sm:$0xff]  ;;  %v47_v4 = vld [vmem:[%s359_s0 + $0x8] sm:$0xff]  ;;  %225 = vset.pattern.permute.xlu0 %v287_v17  ;;  %vm138_vm1 = vcmask 64512   ;;  %s186_s21 = sshll.u32 %s366_s7, 4  ;;  %vm177_vm5 = vcmask 122880   ;;  %s187_s21 = int_to_ptr.hbm [resolvable:$true] %s186_s21 }
   0xb   :  { %v48_v5 = vpack.c.bf16 %v47_v4, %v46_v3  ;;  %v219_v6 = vld [vmem:[%s362_s3 + $0x8] sm:$0xff]  ;;  %v218_v7 = vld [vmem:[%s362_s3] sm:$0xff] }
   0xc   :  { %119 = vmatpush.bf16.msra.mxu1 %v219_v6  ;;  %v226_v9 = vld [vmem:[%s361_s2] ss:$0 sm:$0xff] }
   0xd   :  { %v131_v16 = vld [vmem:[#allocation2] sm:$0x1] }
   0xe   :  { %80 = vmatpush.bf16.msra.mxu0 %v216_v2  ;;  %134 = vperm.xlu0 %225, %v131_v16   ;;  %v227_v19 = vld [vmem:[%s363_s4] ss:$0 sm:$0xff]  ;;  %s288_s4 = smov [#allocation6]  }
   0xf   :  { %v130_v27 = vld [vmem:[%s364_s5] sm:$0x1]  ;;  %s184_s5 = sshll.u32 %s288_s4, 4  ;;  %s185_s5 = int_to_ptr.vmem [resolvable:$true] %s184_s5 }
  0x10   :  { %120 = vmatpush.bf16.msra.mxu1 %v218_v7 }
  0x11   :  { %204 = vmatmul.msk.bf16.vlgmr.msra.gmra.mxu0 %vm69_vm0, %v48_v5 }
  0x80   :  { %v135_v28 = vpop.permute.xlu0 %134 }
  0x81   :  { %v137_v29 = vperm.slane %v135_v28, 0 }
  0x8e   :  { %v82_v8 = vpop.f32.mrf.mxu0 }
  0x8f   :  { %v83_v10 = vadd.f32 %v226_v9, %v82_v8 }
  0x91   :  { %v87_v13 = vmax.f32 %v83_v10, 0.0 }
  0x96   :  { %v84_v11 = vpop.f32.mrf.mxu0 }
  0x97   :  { %v85_v12 = vadd.f32 %v226_v9, %v84_v11 }
  0x99   :  { %v88_v14 = vmax.f32 %v85_v12, 0.0 }
  0x9b   :  { %v89_v15 = vpack.c.bf16 %v88_v14, %v87_v13 }
  0x9d   :  { %213 = vmatmul.msk.bf16.vlgmr.msra.gmra.mxu1 %vm69_vm0, %v89_v15 }
 0x11a   :  { %v122_v18 = vpop.f32.mrf.mxu1 }
 0x11b   :  { %v123_v20 = vadd.f32 %v227_v19, %v122_v18 }
 0x11d   :  { %v127_v23 = vmax.f32 %v123_v20, 0.0 }
 0x122   :  { %v124_v21 = vpop.f32.mrf.mxu1 }
 0x123   :  { %v125_v22 = vadd.f32 %v227_v19, %v124_v21 }
 0x125   :  { %v128_v24 = vmax.f32 %v125_v22, 0.0 }
 0x127   :  { %v129_v25 = vpack.c.bf16 %v128_v24, %v127_v23 }
 0x129   :  { %v143_v26 = vsel %vm138_vm1, %v129_v25, 0 }
 0x12a   :  { %152 = vmatpush.bf16.xpose.msra.mxu2 %v143_v26 }
 0x131   :  { %214 = vmatmul.msk.bf16.vlgmr.msra.gmra.mxu2 %vm138_vm1, %v130_v27 }
 0x1b4   :  { %v154_v30 = vpop.f32.mrf.mxu2 }
 0x1b5   :  { %v155_v31 = vadd.f32 %v154_v30, %v137_v29 }
 0x1b7   :  { %v215_v32 = vmul.f32 -1.442695, %v155_v31 }
 0x1b9   :  { %228 = vpow2.f32 %v215_v32 }
 0x1bc   :  { %v156_v33 = vpop.f32.mrf.mxu2 }
 0x1bf   :  { %v229_v34 = vpop.eup %228 }
 0x1c0   :  { %v161_v35 = vadd.f32 1.0, %v229_v34 }
 0x1c2   :  { %230 = vrcp.f32 %v161_v35  ;;  %v173_v39 = vand.u32 2147483648, %v161_v35  ;;  %v171_v41 = vand.u32 2147483647, %v161_v35  ;;  %vm167_vm3 = vweird.f32 %v161_v35 }
 0x1c4   :  { %v174_v43 = vor.u32 1.1754944e-38, %v173_v39  ;;  %vm172_vm6 = vcmp.eq.f32.partialorder %v171_v41, 8.507059e+37 }
 0x1c8   :  { %v231_v36 = vpop.eup %230 }
 0x1c9   :  { %v163_v37 = vmul.f32 %v231_v36, %v161_v35  ;;  %vm168_vm2 = vweird.f32 %v231_v36 }
 0x1ca   :  { %vm169_vm4 = vmor %vm167_vm3, %vm168_vm2 }
 0x1cb   :  { %v164_v38 = vsub.f32 1.0, %v163_v37 }
 0x1cd   :  { %v165_v40 = vmul.f32 %v231_v36, %v164_v38 }
 0x1cf   :  { %v166_v42 = vadd.f32 %v231_v36, %v165_v40 }
 0x1d1   :  { %v170_v44 = vsel %vm169_vm4, %v231_v36, %v166_v42 }
 0x1d2   :  { %v175_v45 = vsel %vm172_vm6, %v174_v43, %v170_v44 }
 0x1d3   :  { %178 = vst.msk [vmem:[#allocation6] sm:$0x1] %vm177_vm5, %v175_v45 }
 0x1d4   :  { %189 = dma.vmem_to_hbm [thread:$0]  %s185_s5, 16, %s187_s21, [#allocation5]  }
 0x1d5   :  { %282 = dma.done.wait [#allocation5], 16  }
 0x1d6   :  { %283 = vsyncadd [#allocation5], 4294967280 }
 0x1d7   :  { %194 = vsyncpa [#allocation4], 1 }
 0x1d8   :  { %195 = vsyncpa [#allocation5], 1 }

</bundles_post_ra>
